<compile_context>
chip_gen: v6e
topology: v6e:2x2x1
jax: 0.10.0
libtpu: 0.0.40
codegen_flags: <defaults>
</compile_context>

<pallas_src>
import jax
import jax.numpy as jnp
from jax.experimental import pallas as pl
from jax.experimental.pallas import tpu as pltpu


# ---------------------------------------------------------------------------
# Kernels
# ---------------------------------------------------------------------------

def _se_fused_kernel(x_ref, wd_ref, bd_ref, wu_ref, bu_ref, o_ref):
    """One batch image per grid step: pool + excite + recalibrate."""
    x = x_ref[0]                                                   # (C, HW), input dtype

    # Squeeze: global average pool with f32 accumulation inside the reduction
    # (no full-slab f32 copy is kept live).
    pooled = jnp.mean(x, axis=-1, keepdims=True, dtype=jnp.float32)  # (C, 1)

    # Excite: the two 1x1 convs are dense matvecs on the pooled channel vector.
    hidden = jnp.dot(wd_ref[...], pooled, preferred_element_type=jnp.float32)
    hidden = jnp.maximum(hidden + bd_ref[...], 0.0)                # (I, 1)
    scale = jnp.dot(wu_ref[...], hidden, preferred_element_type=jnp.float32)
    scale = jax.nn.sigmoid(scale + bu_ref[...])                    # (C, 1)

    # Recalibrate in the input dtype (no f32 output slab).
    o_ref[0] = x * scale.astype(x.dtype)


def _pool_kernel(x_ref, sum_ref):
    """Accumulate per-(b, c) spatial sums over HW tiles (f32 accumulator)."""
    t = pl.program_id(1)

    @pl.when(t == 0)
    def _():
        sum_ref[...] = jnp.zeros_like(sum_ref)

    sum_ref[0] += jnp.sum(x_ref[0], axis=-1, keepdims=True, dtype=jnp.float32)


def _scale_kernel(x_ref, s_ref, o_ref):
    """Elementwise per-channel recalibration, tiled over (B, HW tiles)."""
    o_ref[0] = x_ref[0] * s_ref[0]                                 # (C, hw_tile) * (C, 1)


# ---------------------------------------------------------------------------
# Wrappers
# ---------------------------------------------------------------------------

# Conservative per-call budget for the fused path (v7x: 64 MiB physical VMEM,
# 32 MiB default scoped).  Fused double-buffers both the input and output slab.
_FUSED_VMEM_BUDGET = 32 << 20


def _choose_hw_tile(hw, c, itemsize, target_bytes=2 << 20):
    """Largest multiple of 128 dividing hw whose (C, tile) block <= target_bytes.

    Falls back to the full hw (always legal: block dim == full array dim) when
    hw has no such divisor (e.g. 7*7=49, 56*56=3136)."""
    max_hw = max(128, target_bytes // max(1, c * itemsize))
    best = None
    for t in range(128, min(hw, max_hw) + 1, 128):
        if hw % t == 0:
            best = t
    return best if best is not None else hw


def _vmem_limit(nbytes):
    return int(min(max(nbytes, 4 << 20), 100 << 20))


def _se_fused(x_flat, w_down, b_down, w_up, b_up):
    B, C, HW = x_flat.shape
    I = w_down.shape[0]
    wd = w_down.astype(jnp.float32)
    bd = b_down.reshape(I, 1).astype(jnp.float32)
    wu = w_up.astype(jnp.float32)
    bu = b_up.reshape(C, 1).astype(jnp.float32)

    slab_bytes = C * HW * x_flat.dtype.itemsize
    # 2x double-buffered input + 2x double-buffered output + temps/weights.
    vmem_needed = 4 * slab_bytes + (2 << 20)

    return pl.pallas_call(
        _se_fused_kernel,
        out_shape=jax.ShapeDtypeStruct((B, C, HW), x_flat.dtype),
        grid_spec=pltpu.PrefetchScalarGridSpec(
            num_scalar_prefetch=0,
            grid=(B,),
            in_specs=[
                pl.BlockSpec((1, C, HW), lambda b: (b, 0, 0)),   # x (per batch)
                pl.BlockSpec((I, C), lambda b: (0, 0)),          # down weight
                pl.BlockSpec((I, 1), lambda b: (0, 0)),          # down bias
                pl.BlockSpec((C, I), lambda b: (0, 0)),          # up weight
                pl.BlockSpec((C, 1), lambda b: (0, 0)),          # up bias
            ],
            out_specs=pl.BlockSpec((1, C, HW), lambda b: (b, 0, 0)),
        ),
        compiler_params=pltpu.CompilerParams(
            dimension_semantics=("parallel",),
            vmem_limit_bytes=_vmem_limit(vmem_needed),
        ),
    )(x_flat, wd, bd, wu, bu)


def _se_two_pass(x_flat, w_down, b_down, w_up, b_up):
    B, C, HW = x_flat.shape
    dtype = x_flat.dtype
    itemsize = dtype.itemsize
    hw_tile = _choose_hw_tile(HW, C, itemsize)
    n_tiles = HW // hw_tile
    tile_bytes = C * hw_tile * itemsize

    # --- Pass 1: global average pool (tiled f32 reduction over HW). ---------
    pool_sums = pl.pallas_call(
        _pool_kernel,
        out_shape=jax.ShapeDtypeStruct((B, C, 1), jnp.float32),
        grid_spec=pltpu.PrefetchScalarGridSpec(
            num_scalar_prefetch=0,
            grid=(B, n_tiles),
            in_specs=[pl.BlockSpec((1, C, hw_tile), lambda b, t: (b, 0, t))],
            out_specs=pl.BlockSpec((1, C, 1), lambda b, t: (b, 0, 0)),
        ),
        compiler_params=pltpu.CompilerParams(
            dimension_semantics=("parallel", "arbitrary"),
            vmem_limit_bytes=_vmem_limit(2 * tile_bytes + (2 << 20)),
        ),
    )(x_flat)

    # --- Excitation on the tiny (B, C) pooled tensor (plain JAX; batched). --
    pooled = pool_sums[:, :, 0] * (1.0 / HW)                              # (B, C)
    hidden = jnp.maximum(
        pooled @ w_down.astype(jnp.float32).T + b_down.astype(jnp.float32)[None, :], 0.0)
    scale = jax.nn.sigmoid(
        hidden @ w_up.astype(jnp.float32).T + b_up.astype(jnp.float32)[None, :])
    scale = scale.astype(dtype).reshape(B, C, 1)

    # --- Pass 2: elementwise recalibration, many parallel grid steps. -------
    return pl.pallas_call(
        _scale_kernel,
        out_shape=jax.ShapeDtypeStruct((B, C, HW), dtype),
        grid_spec=pltpu.PrefetchScalarGridSpec(
            num_scalar_prefetch=0,
            grid=(B, n_tiles),
            in_specs=[
                pl.BlockSpec((1, C, hw_tile), lambda b, t: (b, 0, t)),
                pl.BlockSpec((1, C, 1), lambda b, t: (b, 0, 0)),
            ],
            out_specs=pl.BlockSpec((1, C, hw_tile), lambda b, t: (b, 0, t)),
        ),
        compiler_params=pltpu.CompilerParams(
            dimension_semantics=("parallel", "parallel"),
            vmem_limit_bytes=_vmem_limit(4 * tile_bytes + (2 << 20)),
        ),
    )(x_flat, scale)


def se_block(x_nchw, w_down, b_down, w_up, b_up, *, force_path=None):
    """SEBlock forward.

    x_nchw: (B, C, H, W); w_down: (I, C); b_down: (I,); w_up: (C, I); b_up: (C,).
    force_path in {None, "fused", "two_pass"}.
    """
    B, C, H, W = x_nchw.shape
    assert H == W, "SEBlock's avg_pool2d(kernel_size=W) implies square spatial input"
    HW = H * W
    x_flat = x_nchw.reshape(B, C, HW)

    slab_bytes = C * HW * x_flat.dtype.itemsize
    fused_vmem = 4 * slab_bytes + (2 << 20)
    if force_path is None:
        # Single-pass (HBM optimal) only when there are enough grid steps to
        # pipeline / shard across TCs and the slab fits the VMEM budget.
        use_fused = (B >= 4) and (fused_vmem <= _FUSED_VMEM_BUDGET)
    else:
        use_fused = force_path == "fused"

    if use_fused:
        out_flat = _se_fused(x_flat, w_down, b_down, w_up, b_up)
    else:
        out_flat = _se_two_pass(x_flat, w_down, b_down, w_up, b_up)
    return out_flat.reshape(B, C, H, W)


# ---------------------------------------------------------------------------
# Reference + test
# ---------------------------------------------------------------------------

def _reference(x, wd, bd, wu, bu):
    pooled = jnp.mean(x.astype(jnp.float32), axis=(2, 3))            # (B, C)
    hidden = jnp.maximum(pooled @ wd.T + bd[None, :], 0.0)           # (B, I)
    scale = jax.nn.sigmoid(hidden @ wu.T + bu[None, :])              # (B, C)
    return (x.astype(jnp.float32) * scale[:, :, None, None]).astype(x.dtype)


def _make_inputs(key, B, C, I, H, W, dtype=jnp.float32):
    k_x, k_wd, k_bd, k_wu, k_bu = jax.random.split(key, 5)
    x = jax.random.normal(k_x, (B, C, H, W), dtype=dtype)
    # nn.Conv2d(C, I, 1) weight is (I, C, 1, 1); 1x1 conv == dense (I, C).
    w_down = jax.random.normal(k_wd, (I, C), dtype=jnp.float32) * 0.1
    b_down = jax.random.normal(k_bd, (I,), dtype=jnp.float32) * 0.1
    w_up = jax.random.normal(k_wu, (C, I), dtype=jnp.float32) * 0.1
    b_up = jax.random.normal(k_bu, (C,), dtype=jnp.float32) * 0.1
    return x, w_down, b_down, w_up, b_up


if __name__ == "__main__":
    key = jax.random.PRNGKey(0)
    k1, k2 = jax.random.split(key)

    # Primary small test (HW = 256, multiple of 128): exercise both paths
    # plus the auto-selected one.
    x, wd, bd, wu, bu = _make_inputs(k1, B=2, C=4, I=2, H=16, W=16)
    ref = _reference(x, wd, bd, wu, bu)
    for path in ("fused", "two_pass", None):
        out = jax.block_until_ready(se_block(x, wd, bd, wu, bu, force_path=path))
        assert out.shape == x.shape and out.dtype == x.dtype
        assert jnp.allclose(out, ref, atol=1e-5, rtol=1e-5), f"mismatch on path={path}"

    # Secondary test: HW = 7*7 = 49 (NOT a multiple of 128) to validate that
    # lane padding never leaks into the pooled mean on either path.
    x2, wd2, bd2, wu2, bu2 = _make_inputs(k2, B=2, C=8, I=4, H=7, W=7)
    ref2 = _reference(x2, wd2, bd2, wu2, bu2)
    for path in ("fused", "two_pass"):
        out2 = jax.block_until_ready(se_block(x2, wd2, bd2, wu2, bu2, force_path=path))
        assert jnp.allclose(out2, ref2, atol=1e-5, rtol=1e-5), f"mismatch on path={path}"

    print("KERNEL_OK")
</pallas_src>

<mosaic_0001>
module attributes {stable_mosaic.version = 11 : i64} {
  func.func @_se_fused_kernel(%arg0: i32, %arg1: memref<1x4x256xf32, #tpu.memory_space<vmem>>, %arg2: memref<2x4xf32, #tpu.memory_space<vmem>>, %arg3: memref<2x1xf32, #tpu.memory_space<vmem>>, %arg4: memref<4x2xf32, #tpu.memory_space<vmem>>, %arg5: memref<4x1xf32, #tpu.memory_space<vmem>>, %arg6: memref<1x4x256xf32, #tpu.memory_space<vmem>>) attributes {dimension_semantics = [#tpu.dimension_semantics<parallel>], iteration_bounds = array<i64: 2>, scalar_prefetch = 0 : i64, scratch_operands = 0 : i64, tpu.core_type = #tpu.core_type<tc>, window_params = [{transform_indices = @transform_0, window_bounds = array<i64: 1, 4, 256>}, {pipeline_mode = #tpu.pipeline_mode<synchronous>, transform_indices = @transform_1, window_bounds = array<i64: 2, 4>}, {pipeline_mode = #tpu.pipeline_mode<synchronous>, transform_indices = @transform_2, window_bounds = array<i64: 2, 1>}, {pipeline_mode = #tpu.pipeline_mode<synchronous>, transform_indices = @transform_3, window_bounds = array<i64: 4, 2>}, {pipeline_mode = #tpu.pipeline_mode<synchronous>, transform_indices = @transform_4, window_bounds = array<i64: 4, 1>}, {transform_indices = @transform_5, window_bounds = array<i64: 1, 4, 256>}]} {
    %c0 = arith.constant 0 : index
    %c0_0 = arith.constant 0 : index
    %c0_1 = arith.constant 0 : index
    %0 = vector.load %arg1[%c0, %c0_0, %c0_1] : memref<1x4x256xf32, #tpu.memory_space<vmem>>, vector<1x4x256xf32>
    %1 = vector.shape_cast %0 : vector<1x4x256xf32> to vector<4x256xf32>
    %cst = arith.constant dense<0.000000e+00> : vector<4xf32>
    %2 = vector.multi_reduction <add>, %1, %cst [1] : vector<4x256xf32> to vector<4xf32>
    %3 = vector.shape_cast %2 : vector<4xf32> to vector<4x1xf32>
    %cst_2 = arith.constant 2.560000e+02 : f32
    %4 = vector.broadcast %cst_2 : f32 to vector<4x1xf32>
    %5 = arith.divf %3, %4 : vector<4x1xf32>
    %c0_3 = arith.constant 0 : index
    %c0_4 = arith.constant 0 : index
    %6 = vector.load %arg2[%c0_3, %c0_4] : memref<2x4xf32, #tpu.memory_space<vmem>>, vector<2x4xf32>
    %cst_5 = arith.constant dense<0.000000e+00> : vector<2x1xf32>
    %7 = tpu.matmul %6, %5, %cst_5 {dimension_numbers = #tpu.dot_dimension_numbers<[1], [0], [0], [1], [0, 0, 1, 1], [], []>} : vector<2x4xf32>, vector<4x1xf32>, vector<2x1xf32> -> vector<2x1xf32>
    %c0_6 = arith.constant 0 : index
    %c0_7 = arith.constant 0 : index
    %8 = vector.load %arg3[%c0_6, %c0_7] : memref<2x1xf32, #tpu.memory_space<vmem>>, vector<2x1xf32>
    %9 = arith.addf %7, %8 : vector<2x1xf32>
    %cst_8 = arith.constant 0.000000e+00 : f32
    %10 = vector.broadcast %cst_8 : f32 to vector<2x1xf32>
    %11 = arith.maximumf %9, %10 : vector<2x1xf32>
    %c0_9 = arith.constant 0 : index
    %c0_10 = arith.constant 0 : index
    %12 = vector.load %arg4[%c0_9, %c0_10] : memref<4x2xf32, #tpu.memory_space<vmem>>, vector<4x2xf32>
    %cst_11 = arith.constant dense<0.000000e+00> : vector<4x1xf32>
    %13 = tpu.matmul %12, %11, %cst_11 {dimension_numbers = #tpu.dot_dimension_numbers<[1], [0], [0], [1], [0, 0, 1, 1], [], []>} : vector<4x2xf32>, vector<2x1xf32>, vector<4x1xf32> -> vector<4x1xf32>
    %c0_12 = arith.constant 0 : index
    %c0_13 = arith.constant 0 : index
    %14 = vector.load %arg5[%c0_12, %c0_13] : memref<4x1xf32, #tpu.memory_space<vmem>>, vector<4x1xf32>
    %15 = arith.addf %13, %14 : vector<4x1xf32>
    %16 = arith.negf %15 : vector<4x1xf32>
    %17 = math.exp %16 : vector<4x1xf32>
    %cst_14 = arith.constant 1.000000e+00 : f32
    %18 = vector.broadcast %cst_14 : f32 to vector<4x1xf32>
    %19 = arith.addf %18, %17 : vector<4x1xf32>
    %20 = arith.divf %18, %19 : vector<4x1xf32>
    %21 = vector.broadcast %20 : vector<4x1xf32> to vector<4x256xf32>
    %22 = arith.mulf %1, %21 : vector<4x256xf32>
    %c0_15 = arith.constant 0 : index
    %c0_16 = arith.constant 0 : index
    %c0_17 = arith.constant 0 : index
    %23 = vector.load %arg6[%c0_15, %c0_16, %c0_17] : memref<1x4x256xf32, #tpu.memory_space<vmem>>, vector<1x4x256xf32>
    %24 = vector.shape_cast %23 : vector<1x4x256xf32> to vector<4x256xf32>
    %25 = vector.shape_cast %22 : vector<4x256xf32> to vector<1x4x256xf32>
    tpu.vector_store %arg6[%c0_15, %c0_16, %c0_17], %25 {strides = array<i32>} : memref<1x4x256xf32, #tpu.memory_space<vmem>>, vector<1x4x256xf32>,
    return
  }
  func.func @transform_0(%arg0: i32) -> (i32, i32, i32) {
    %c0_i32 = arith.constant 0 : i32
    %c0_i32_0 = arith.constant 0 : i32
    %c0_i32_1 = arith.constant 0 : i32
    return %arg0, %c0_i32, %c0_i32_0 : i32, i32, i32
  }
  func.func @transform_1(%arg0: i32) -> (i32, i32) {
    %c0_i32 = arith.constant 0 : i32
    %c0_i32_0 = arith.constant 0 : i32
    %c0_i32_1 = arith.constant 0 : i32
    return %c0_i32, %c0_i32_0 : i32, i32
  }
  func.func @transform_2(%arg0: i32) -> (i32, i32) {
    %c0_i32 = arith.constant 0 : i32
    %c0_i32_0 = arith.constant 0 : i32
    %c0_i32_1 = arith.constant 0 : i32
    return %c0_i32, %c0_i32_0 : i32, i32
  }
  func.func @transform_3(%arg0: i32) -> (i32, i32) {
    %c0_i32 = arith.constant 0 : i32
    %c0_i32_0 = arith.constant 0 : i32
    %c0_i32_1 = arith.constant 0 : i32
    return %c0_i32, %c0_i32_0 : i32, i32
  }
  func.func @transform_4(%arg0: i32) -> (i32, i32) {
    %c0_i32 = arith.constant 0 : i32
    %c0_i32_0 = arith.constant 0 : i32
    %c0_i32_1 = arith.constant 0 : i32
    return %c0_i32, %c0_i32_0 : i32, i32
  }
  func.func @transform_5(%arg0: i32) -> (i32, i32, i32) {
    %c0_i32 = arith.constant 0 : i32
    %c0_i32_0 = arith.constant 0 : i32
    %c0_i32_1 = arith.constant 0 : i32
    return %arg0, %c0_i32, %c0_i32_0 : i32, i32, i32
  }
}

</mosaic_0001>

<bundles_post_ra>
// kernel: tpu_custom_call.1
= control target key start
LH: loop header
LB: loop body
LE: loop exit
PB: predicated region body
PF: predicated region fallthrough
CT: control target
= control target key end

     0   :  { %10 = vsyncpa [#allocation3], 0  ;;  %s899_s0 = inlined_call_operand.hbm [shape: f32[2,4,256], index: 0, kind: input, shape index: {}]   ;;  %s900_s1 = inlined_call_operand.vmem [shape: f32[2,4], index: 1, kind: input, shape index: {}]   ;;  %s901_s2 = inlined_call_operand.vmem [shape: f32[2,1], index: 2, kind: input, shape index: {}]   ;;  %s902_s3 = inlined_call_operand.vmem [shape: f32[4,2], index: 3, kind: input, shape index: {}]   ;;  %s903_s4 = inlined_call_operand.vmem [shape: f32[4,1], index: 4, kind: input, shape index: {}]   ;;  %s904_s5 = inlined_call_operand.hbm [shape: f32[2,4,256], index: 5, kind: output, shape index: {}]  }
   0x1   :  { %12 = vsyncpa [#allocation3 + $0x1], 0 }
   0x2   :  { %13 = vsyncpa [#allocation4], 0 }
   0x3   :  { %15 = vsyncpa [#allocation4 + $0x1], 0  ;;  %s739_s18 = smov 0   ;;  %s741_s19 = smov 0  }
   0x4   :  { %s743_s20 = smov 0   ;;  %s745_s21 = smov 0  }
   0x5 LB: > { %s760_s22 = sadd.s32 4294967295, %s701_s21   ;;  %s518_s23 = sadd.s32 4294967294, %s701_s21   ;;  %s701_s21 = sphi %s745_s21, %s921_s21   ;;  %s697_s20 = sphi %s743_s20, %s920_s20   ;;  %s693_s19 = sphi %s741_s19, %s919_s19   ;;  %s689_s18 = sphi %s739_s18, %s918_s18  }
   0x6   : > { %s764_s24 = sadd.s32 1, %s701_s21   ;;  %s28_s25 = sadd.s32 1, %s697_s20 }
   0x7   : > { %s25_s26 = ssub.s32 %s701_s21, %s764_s24  ;;  %p35_p0 = scmp.ne.s32.totalorder %s697_s20, %s693_s19 }
   0x8   : > { %p26_p1 = scmp.eq.s32.totalorder %s25_s26, 0  ;;  %p36_p2 = scmp.eq.s32.totalorder %s701_s21, 0 }
   0x9   : > { %p41_p3 = scmp.ne.s32.totalorder %s693_s19, %s689_s18  ;;  %p42_p4 = scmp.eq.s32.totalorder %s760_s22, 0 }
   0xa   : > { %s776_s27 = scalar_select %p26_p1, %s697_s20, %s28_s25  }
   0xb   : > { %p778_p5 = por %p36_p2, %p35_p0  ;;  %p782_p6 = por %p42_p4, %p41_p3 }
   0xc   : > { %p149_p7 = scmp.eq.s32.totalorder %s760_s22, 1  ;;  %p155_p8 = scmp.eq.s32.totalorder %s518_s23, 1 }
   0xd   : > { %s908_s29 = scalar_select %p782_p6, 1, 0 }
   0xe   : > { %p565_p10 = scmp.lt.s32.totalorder %s701_s21, 2  ;;  %p789_p11 = por %p149_p7, %p35_p0 }
   0xf   : > { %p793_p12 = por %p155_p8, %p41_p3  ;;  %s187_s7 = sand.u32 1, %s697_s20  }
  0x10   : > { %s909_s30 = scalar_select %p789_p11, 1, 0 }
  0x11   : > { %s910_s6 = scalar_select %p793_p12, 1, 0 }
  0x12   : > { %s537_s8 = sshll.u32 %s701_s21, 7  ;;  %s521_s9 = sshll.u32 %s187_s7, 3 }
  0x13   : > { %s802_s12 = scalar_lea.hbm %s899_s0, %s537_s8  ;;  %s191_s13 = scalar_lea.vmem [#allocation2], %s521_s9 }
  0x14   : > { %s199_s14 = sshll.u32 %s191_s13, 4  ;;  %p806_p13 = pnand %p565_p10, %p778_p5  ;;  %s810_s14 = int_to_ptr.vmem [resolvable:$true] %s199_s14 }
  0x15   : > { %s188_s16 = scalar_lea.sflag [#allocation3], %s187_s7  ;;  %s609_s17 = scalar_lea.hbm %s802_s12, 128 }
  0x16   : > { %p610_p2 = scmp.ne.s32.totalorder %s802_s12, %s609_s17  ;;  %p611_p3 = pneg %p806_p13 }
  0x17   : > { %s614_s26 = scalar_lea.hbm %s899_s0, 256  ;;  %p615_p5 = scmp.lt.s32.totalorder %s802_s12, %s899_s0 }
  0x18   : > { %p612_p4 = pnand %p611_p3, %p610_p2  ;;  %p616_p8 = scmp.lt.s32.totalorder %s614_s26, %s609_s17 }
  0x1a   : > { %p613_p7 = pneg %p612_p4  ;;  %p617_p10 = por %p616_p8, %p615_p5 }
  0x1c   : > { %p618_p9 = pnand %p617_p10, %p613_p7 }
  0x1e   : > { %621 = shalt.err (!%p618_p9)
}
  0x1f   : > { %s622_s7 = scalar_lea.vmem %s810_s14, 128  ;;  %s703_s9 = smov [#allocation2]  }
  0x20   : > { %p623_p0 = scmp.ne.s32.totalorder %s810_s14, %s622_s7  ;;  %s627_s10 = sshll.u32 %s703_s9, 4  ;;  %s628_s10 = int_to_ptr.vmem [resolvable:$false] %s627_s10 }
  0x21   : > { %s629_s11 = scalar_lea.vmem %s628_s10, 256  ;;  %p630_p4 = scmp.lt.s32.totalorder %s810_s14, %s628_s10 }
  0x22   : > { %p625_p1 = pnand %p623_p0, %p611_p3  ;;  %p631_p12 = scmp.lt.s32.totalorder %s629_s11, %s622_s7 }
  0x24   : > { %p626_p2 = pneg %p625_p1  ;;  %p632_p11 = por %p631_p12, %p630_p4 }
  0x26   : > { %p633_p6 = pnand %p632_p11, %p626_p2 }
  0x28   : > { %636 = shalt.err (!%p633_p6)
}
  0x29   : > { %560 = dma.hbm_to_vmem [thread:$0]  (!%p806_p13), %s802_s12, 128, %s810_s14, %s188_s16  }
  0x2a   : > { %p912_p9 = scmp.lt.s32.totalorder %s701_s21, 3  ;;  %p913_p7 = scmp.ge.s32.totalorder %s701_s21, 1 }
  0x2c   : > { %p205_p0 = pnand %p913_p7, %p912_p9 }
  0x2d   : > { %s837_s13 = sand.u32 (!%p205_p0), 1, %s693_s19   ;;  %p914_p6 = scmp.ne.s32.totalorder (!%p205_p0), %s908_s29, 0 }
  0x2e   : > { %208 = sbr.rel (%p205_p0) target bundleno = 765 (0x2fd), region = 40  ;;  %s525_s17 = sshll.u32 (!%p205_p0), %s837_s13, 3 }
  0x2f   : > { %s211_s23 = scalar_lea.sflag (!%p205_p0), [#allocation3], %s837_s13  ;;  %s214_s15 = scalar_lea.vmem (!%p205_p0), [#allocation2], %s525_s17 }
  0x33   : > { %680 = dma.done.wait (%p914_p6), %s211_s23, 128  }
  0x34   : > { %682 = vsyncadd (%p914_p6), %s211_s23, 4294967168  ;;  %vm245_vm0 = vcmask 1043456   ;;  %v241_v0 = vld [vmem:[%s214_s15] sm:$0xff]  ;;  %v704_v5 = vmov 0.0   ;;  %vm705_vm1 = vmmov 0   ;;  %vm255_vm2 = vcmask 31744  }
  0x35   : > { %v243_v1 = vcombine.high %v241_v0, %v241_v0  ;;  %v246_v2 = vsel %vm245_vm0, %v241_v0, 0.0  ;;  %543 = vmatprep.subr.mxu0 %v704_v5  ;;  %548 = vmatprep.subr.mxu1 %v704_v5  ;;  %v253_v8 = vld [vmem:[%s900_s1] sm:$0x3]  ;;  %vm339_vm3 = vcmask 1041408   ;;  %vm335_vm4 = vcmask 15360   ;;  %s538_s7 = sshll.u32 %s760_s22, 7 }
  0x36   : > { %545 = vmatprep.mubr.msk.f32.mxu0 %vm705_vm1, %v704_v5  ;;  %550 = vmatprep.mubr.msk.f32.mxu1 %vm705_vm1, %v704_v5  ;;  %v254_v9 = vld [vmem:[%s901_s2] sm:$0x3]  ;;  %v706_v15 = vmov 0   ;;  %v707_v24 = vmov 839922192   ;;  %v426_v26 = vlaneseq  ;;  %s240_s9 = scalar_lea.vmem [#allocation5], %s525_s17  ;;  %s446_s15 = scalar_lea.hbm %s904_s5, %s538_s7 }
  0x37   : > { %v247_v3 = vsel %vm245_vm0, %v243_v1, 0.0  ;;  %v333_v14 = vld [vmem:[%s902_s3] sm:$0xf]  ;;  %603 = vset.pattern.permute.xlu0 %v706_v15  ;;  %v424_v25 = vunpack.c.l.s4 %v707_v24  ;;  %s448_s10 = sshll.u32 %s240_s9, 4  ;;  %s434_s12 = scalar_lea.sflag [#allocation4], %s837_s13  ;;  %s449_s10 = int_to_ptr.vmem [resolvable:$true] %s448_s10 }
  0x38   : > { %v248_v4 = vadd.f32 %v247_v3, %v246_v2  ;;  %v334_v16 = vld [vmem:[%s903_s4] sm:$0xf]  ;;  %v427_v28 = vshrl.u32 %v426_v26, 7  ;;  %s637_s29 = scalar_lea.vmem %s449_s10, 128  ;;  %p915_p12 = scmp.ne.s32.totalorder %s909_s30, 0 }
  0x39   : > { %v425_v27 = vunpack.c.0.s8 %v424_v25  ;;  %p638_p11 = scmp.ne.s32.totalorder %s449_s10, %s637_s29  ;;  %s708_s14 = smov [#allocation5]  }
  0x3a   : > { %249 = vadd.xlane.f32.xlu0 %v248_v4  ;;  %s641_s16 = sshll.u32 %s708_s14, 4  ;;  %s642_s16 = int_to_ptr.vmem [resolvable:$false] %s641_s16 }
  0x3b   : > { %v428_v29 = vsub.s32 %v425_v27, %v427_v28  ;;  %p639_p13 = pnand %p638_p11, %p915_p12  ;;  %s643_s22 = scalar_lea.vmem %s642_s16, 256 }
  0x3c   : > { %p644_p3 = scmp.lt.s32.totalorder %s449_s10, %s642_s16  ;;  %p645_p5 = scmp.lt.s32.totalorder %s643_s22, %s637_s29 }
  0x3d   : > { %p640_p1 = pneg %p639_p13 }
  0x3e   : > { %p646_p8 = por %p645_p5, %p644_p3 }
  0x40   : > { %p647_p10 = pnand %p646_p8, %p640_p1 }
  0xc3   : > { %v250_v6 = vpop.xlane.xlu0 %249 }
  0xc4   : > { %v252_v7 = vmul.f32 0.00390625, %v250_v6 }
  0xc6   : > { %544 = vmatpush3.msk.msra.mxu0 %vm245_vm0, %v252_v7 }
  0xc7   : > { %546 = vmatmul.mubr.msk.f32.vlgmr.msra.gmra.mxu0 %vm255_vm2, %v253_v8 }
 0x187   : > { %v328_v10 = vpop.f32.mrf.mxu0 }
 0x188   : > { %v329_v11 = vadd.f32 %v328_v10, %v254_v9 }
 0x189   : > { %v547_v12 = vpop.f32.mrf.mxu0 }
 0x18a   : > { %v332_v13 = vmax.f32 %v329_v11, 0.0 }
 0x18c   : > { %549 = vmatpush3.msk.msra.mxu1 %vm339_vm3, %v332_v13 }
 0x18d   : > { %551 = vmatmul.mubr.msk.f32.vlgmr.msra.gmra.mxu1 %vm335_vm4, %v333_v14 }
 0x24d   : > { %v409_v17 = vpop.f32.mrf.mxu1 }
 0x24e   : > { %v410_v18 = vadd.f32 %v409_v17, %v334_v16 }
 0x24f   : > { %v552_v19 = vpop.f32.mrf.mxu1 }
 0x250   : > { %v531_v20 = vmul.f32 -1.442695, %v410_v18 }
 0x252   : > { %605 = vpow2.f32 %v531_v20 }
 0x25f   : > { %v606_v21 = vpop.eup %605 }
 0x260   : > { %v416_v22 = vadd.f32 1.0, %v606_v21 }
 0x262   : > { %607 = vrcp.f32 %v416_v22 }
 0x26f   : > { %v608_v23 = vpop.eup %607 }
 0x270   : > { %421 = vperm.xlu0 %603, %v608_v23  }
 0x2eb   : > { %v422_v30 = vpop.permute.xlu0 %421 }
 0x2ec   : > { %v429_v31 = vrot.slane %v422_v30, %v428_v29 }
 0x2ee   : > { %v431_v32 = vmul.f32 %v429_v31, %v241_v0 }
 0x2f0   : > { %432 = vst [vmem:[%s240_s9] sm:$0xff] %v431_v32 }
 0x2f1   : > { %650 = shalt.err (!%p647_p10)
}
 0x2f2   : > { %s651_s17 = scalar_lea.hbm %s446_s15, 128  ;;  %s655_s26 = scalar_lea.hbm %s904_s5, 256 }
 0x2f3   : > { %p652_p2 = scmp.ne.s32.totalorder %s446_s15, %s651_s17  ;;  %p656_p7 = scmp.lt.s32.totalorder %s446_s15, %s904_s5 }
 0x2f4   : > { %p657_p0 = scmp.lt.s32.totalorder %s655_s26, %s651_s17 }
 0x2f5   : > { %p653_p4 = pnand %p652_p2, %p915_p12 }
 0x2f6   : > { %p658_p6 = por %p657_p0, %p656_p7 }
 0x2f7   : > { %p654_p9 = pneg %p653_p4 }
 0x2f9   : > { %p659_p11 = pnand %p658_p6, %p654_p9 }
 0x2fb   : > { %662 = shalt.err (!%p659_p11)
}
 0x2fc   : > { %555 = dma.vmem_to_hbm [thread:$0]  (%p915_p12), %s449_s10, 128, %s446_s15, %s434_s12  }
 0x2fd PF: > { %s460_s7 = sand.u32 1, %s689_s18   ;;  %p916_p13 = scmp.ne.s32.totalorder %s910_s6, 0 }
 0x2fe   : > { %p917_p1 = scmp.ge.s32.totalorder %s701_s21, 2  ;;  %s461_s9 = scalar_lea.sflag [#allocation4], %s460_s7 }
 0x300   : > { %p562_p3 = pnand %p917_p1, %p916_p13 }
 0x302   : > { %p563_p5 = pneg %p562_p3 }
 0x304   : > { %684 = dma.done.wait (%p563_p5), %s461_s9, 128  }
 0x305   : > { %686 = vsyncadd (%p563_p5), %s461_s9, 4294967168  ;;  %p18_p8 = scmp.ge.s32.totalorder %s764_s24, 4   ;;  %s918_s18 = smov %s693_s19 }
 0x306   : > { %s919_s19 = smov %s697_s20  ;;  %s920_s20 = smov %s776_s27 }
 0x307   : > { %s921_s21 = smov %s764_s24  ;;  %20 = sbr.rel (!%p18_p8) target bundleno = 5 (0x5), region = 85 }
 0x30c   :  { %466 = vsyncpa [#allocation3], 1 }
 0x30d   :  { %468 = vsyncpa [#allocation3 + $0x1], 1 }
 0x30e   :  { %469 = vsyncpa [#allocation4], 1 }
 0x30f   :  { %471 = vsyncpa [#allocation4 + $0x1], 1 }

</bundles_post_ra>
